<compile_context>
chip_gen: v6e
topology: v6e:2x2x1
jax: 0.10.0
libtpu: 0.0.40
codegen_flags: <defaults>
</compile_context>

<pallas_src>
import math

import jax
import jax.numpy as jnp
from jax.experimental import pallas as pl
from jax.experimental.pallas import tpu as pltpu


# ---------------------------------------------------------------------------
# Kernels: pure broadcast-add + store (matmuls hoisted to the wrapper).
# ---------------------------------------------------------------------------

def _add_hwc_kernel(ay_ref, xb_ref, out_ref):
    # ay_ref:  (th, dim)      row tile of pos_y^T @ Wy
    # xb_ref:  (Wp, dim)      pos_x^T @ Wx + bias   (grid-invariant, resident)
    # out_ref: (th, Wp, dim)  channels-last output tile (lane dim = dim)
    out = ay_ref[...][:, None, :] + xb_ref[...][None, :, :]   # f32 VPU add
    out_ref[...] = out.astype(out_ref.dtype)                  # cast at store


def _add_chw_kernel(ayt_ref, xbt_ref, out_ref):
    # ayt_ref: (td, Hp)       channel tile of (pos_y^T @ Wy)^T
    # xbt_ref: (td, Wp)       channel tile of (pos_x^T @ Wx + bias)^T
    # out_ref: (td, Hp, Wp)   NCHW-direct output tile (lane dim = Wp >= 128)
    out = ayt_ref[...][:, :, None] + xbt_ref[...][:, None, :]
    out_ref[...] = out.astype(out_ref.dtype)


# ---------------------------------------------------------------------------
# Tiling helpers.
# ---------------------------------------------------------------------------

def _round_up(x, m):
    return ((x + m - 1) // m) * m


def _pick_tile(n_rows, bytes_per_row, budget_bytes):
    """Largest multiple-of-8 tile along the tiled axis whose output block stays
    under `budget_bytes`.  If the whole axis fits in one block, split it in two
    (v7x has 2 TensorCores; the extra ~0.35us grid step is noise elsewhere).
    The caller pads the axis to a multiple of the returned tile."""
    n8 = _round_up(n_rows, 8)
    by_budget = max(8, (budget_bytes // max(bytes_per_row, 1)) // 8 * 8)
    tile = min(n8, by_budget)
    if tile >= n8 and n8 >= 16 and (n8 // 2) % 8 == 0:
        tile = n8 // 2
    return tile


def _vmem_limit(block_bytes):
    # Double-buffered blocks + slack; floor/cap keep it legal on every gen
    # (v7x: 64 MiB physical; v5e/v6e: 128 MiB -- raise budget_bytes there).
    need = 2 * block_bytes + (2 << 20)
    return int(min(max(need, 8 << 20), 32 << 20))


def _run_hwc(ay, xb, out_dtype, row_tile, budget_bytes):
    """Channels-last slab: out[h, w, d] = ay[h, d] + xb[w, d]."""
    Hp, dim = ay.shape
    Wp, dim2 = xb.shape
    assert dim == dim2
    itemsize = jnp.dtype(out_dtype).itemsize
    th = row_tile if row_tile is not None else _pick_tile(
        Hp, Wp * dim * itemsize, budget_bytes)
    hp_pad = _round_up(Hp, th)
    if hp_pad != Hp:                                  # padded rows: harmless
        ay = jnp.pad(ay, ((0, hp_pad - Hp), (0, 0)))

    block_bytes = (th * Wp * dim * itemsize            # output block
                   + th * dim * ay.dtype.itemsize      # ay tile
                   + Wp * dim * xb.dtype.itemsize)     # xb (resident)

    out = pl.pallas_call(
        _add_hwc_kernel,
        out_shape=jax.ShapeDtypeStruct((hp_pad, Wp, dim), out_dtype),
        grid_spec=pltpu.PrefetchScalarGridSpec(
            num_scalar_prefetch=0,
            grid=(hp_pad // th,),
            in_specs=[
                pl.BlockSpec((th, dim), lambda h: (h, 0)),
                # xb is grid-invariant; single-buffering it would save
                # Wp*dim*4 B of VMEM -- kept default-buffered for portability.
                pl.BlockSpec((Wp, dim), lambda h: (0, 0)),
            ],
            out_specs=pl.BlockSpec((th, Wp, dim), lambda h: (h, 0, 0)),
        ),
        compiler_params=pltpu.CompilerParams(
            dimension_semantics=("parallel",),
            vmem_limit_bytes=_vmem_limit(block_bytes)),
    )(ay, xb)
    return out[:Hp] if hp_pad != Hp else out


def _run_chw(ayt, xbt, out_dtype, chan_tile, budget_bytes):
    """NCHW-direct slab: out[d, h, w] = ayt[d, h] + xbt[d, w]. Use when
    Wp % 128 == 0 so the lane dim stays dense (no masked partial stores)."""
    dim, Hp = ayt.shape
    dim2, Wp = xbt.shape
    assert dim == dim2
    itemsize = jnp.dtype(out_dtype).itemsize
    td = chan_tile if chan_tile is not None else _pick_tile(
        dim, Hp * Wp * itemsize, budget_bytes)
    dim_pad = _round_up(dim, td)
    if dim_pad != dim:
        ayt = jnp.pad(ayt, ((0, dim_pad - dim), (0, 0)))
        xbt = jnp.pad(xbt, ((0, dim_pad - dim), (0, 0)))

    block_bytes = (td * Hp * Wp * itemsize
                   + td * Hp * ayt.dtype.itemsize
                   + td * Wp * xbt.dtype.itemsize)

    out = pl.pallas_call(
        _add_chw_kernel,
        out_shape=jax.ShapeDtypeStruct((dim_pad, Hp, Wp), out_dtype),
        grid_spec=pltpu.PrefetchScalarGridSpec(
            num_scalar_prefetch=0,
            grid=(dim_pad // td,),
            in_specs=[
                pl.BlockSpec((td, Hp), lambda d: (d, 0)),
                pl.BlockSpec((td, Wp), lambda d: (d, 0)),
            ],
            out_specs=pl.BlockSpec((td, Hp, Wp), lambda d: (d, 0, 0)),
        ),
        compiler_params=pltpu.CompilerParams(
            dimension_semantics=("parallel",),
            vmem_limit_bytes=_vmem_limit(block_bytes)),
    )(ayt, xbt)
    return out[:dim] if dim_pad != dim else out


# ---------------------------------------------------------------------------
# Module.
# ---------------------------------------------------------------------------

class PositionalEncodingLearned2d:
    """JAX / Pallas port of the learned 2D positional encoding module."""

    def __init__(self, H=32, W=32, hidden_dim=256, dim=768, key=None):
        if key is None:
            key = jax.random.PRNGKey(0)
        k1, k2, k3, k4 = jax.random.split(key, 4)
        self.H, self.W, self.hidden_dim, self.dim = H, W, hidden_dim, dim

        # TODO(synk): PyTorch trunc_normal_(std=0.02) truncates at +/-2 (abs),
        # not +/-2*std; distribution differs slightly but kernel math is dtype/
        # shape-identical.
        self.pos_embed_y = (
            0.02 * jax.random.truncated_normal(k1, -2.0, 2.0,
                                               (1, hidden_dim, H), jnp.float32))
        self.pos_embed_x = (
            0.02 * jax.random.truncated_normal(k2, -2.0, 2.0,
                                               (1, hidden_dim, W), jnp.float32))

        # Conv2d(hidden_dim*2, dim, 1) params (PyTorch default kaiming-uniform
        # bound = 1/sqrt(fan_in)); kept as (dim, 2*hidden) for the reference
        # path and pre-split / pre-transposed halves for the projections.
        fan_in = hidden_dim * 2
        bound = 1.0 / math.sqrt(fan_in)
        self.conv_weight = jax.random.uniform(
            k3, (dim, 2 * hidden_dim), jnp.float32, -bound, bound)
        self.conv_bias = jax.random.uniform(
            k4, (dim,), jnp.float32, -bound, bound)
        self.wy = jnp.transpose(self.conv_weight[:, :hidden_dim])  # (hidden, dim)
        self.wx = jnp.transpose(self.conv_weight[:, hidden_dim:])  # (hidden, dim)

        # Cached projections for the H==Hp, W==Wp fast path (both layouts),
        # so a forward call dispatches straight into the pallas_call.
        pos_y_hc = jnp.transpose(self.pos_embed_y[0])               # (H, hidden)
        pos_x_wc = jnp.transpose(self.pos_embed_x[0])               # (W, hidden)
        self._ay0 = pos_y_hc @ self.wy                              # (H, dim)
        self._xb0 = pos_x_wc @ self.wx + self.conv_bias[None, :]    # (W, dim)
        self._ay0_t = jnp.transpose(self._ay0)                      # (dim, H)
        self._xb0_t = jnp.transpose(self._xb0)                      # (dim, W)

    def interpolate_pos_encoding(self, B, Hp, Wp, mask=None):
        # Returns UNBATCHED (1, hidden, Hp) / (1, hidden, Wp): the batch copies
        # are identical by construction, so batch expansion happens after the
        # kernel (avoids Bx redundant compute + HBM traffic).
        pos_y = self.pos_embed_y
        pos_x = self.pos_embed_x
        if mask is not None:
            # TODO(synk): per-sample masked interpolation needs data-dependent
            # output sizes; no clean static-shape Pallas equivalent.
            raise NotImplementedError("mask path not supported")
        if self.H != Hp:
            # TODO(synk): verify jax.image.resize 'linear' matches PyTorch
            # F.interpolate(align_corners=False) bit-for-bit if this path is used.
            pos_y = jax.image.resize(pos_y, (1, self.hidden_dim, Hp), "linear")
        if self.W != Wp:
            pos_x = jax.image.resize(pos_x, (1, self.hidden_dim, Wp), "linear")
        return pos_y, pos_x

    def forward(self, B, Hp, Wp, mask=None, out_dtype=jnp.float32,
                row_tile=None, budget_bytes=8 << 20, expand_batch=True):
        if mask is not None:
            raise NotImplementedError("mask path not supported")

        if self.H == Hp and self.W == Wp:
            ay, xb = self._ay0, self._xb0
            ayt, xbt = self._ay0_t, self._xb0_t
        else:
            pos_y, pos_x = self.interpolate_pos_encoding(B, Hp, Wp)
            ay = jnp.transpose(pos_y[0]) @ self.wy                       # (Hp, dim)
            xb = jnp.transpose(pos_x[0]) @ self.wx + self.conv_bias[None, :]
            ayt, xbt = jnp.transpose(ay), jnp.transpose(xb)

        if Wp % 128 == 0:
            # NCHW-direct: lane dim = Wp (dense) -> no post-kernel transpose.
            out_dhw = _run_chw(ayt, xbt, out_dtype, row_tile, budget_bytes)
        else:
            # Channels-last slab (lane dim = dim), then one slab transpose.
            out_hwd = _run_hwc(ay, xb, out_dtype, row_tile, budget_bytes)
            out_dhw = jnp.transpose(out_hwd, (2, 0, 1))                  # (dim,Hp,Wp)

        if not expand_batch:
            return out_dhw                 # fused consumers: add batch lazily
        # Under jit this broadcast fuses into the consumer; eager it
        # materializes B copies (kept for parity with the PyTorch module).
        return jnp.broadcast_to(out_dhw[None], (B, self.dim, Hp, Wp))


# ---------------------------------------------------------------------------
# Pure-JAX reference (mirrors the PyTorch cat + 1x1 conv forward).
# ---------------------------------------------------------------------------

def _reference_forward(module, B, Hp, Wp):
    pos_y, pos_x = module.interpolate_pos_encoding(B, Hp, Wp)
    pos_y = jnp.broadcast_to(pos_y, (B, module.hidden_dim, Hp))
    pos_x = jnp.broadcast_to(pos_x, (B, module.hidden_dim, Wp))
    pos = jnp.concatenate(
        [jnp.broadcast_to(pos_y[:, :, :, None], (B, module.hidden_dim, Hp, Wp)),
         jnp.broadcast_to(pos_x[:, :, None, :], (B, module.hidden_dim, Hp, Wp))],
        axis=1)                                          # (B, 2*hidden, Hp, Wp)
    out = jnp.einsum("bchw,dc->bdhw", pos, module.conv_weight)
    return out + module.conv_bias[None, :, None, None]


if __name__ == "__main__":
    # --- Test 1: channels-last kernel path (Wp < 128), small shapes -----------
    B, Hp, Wp = 2, 16, 16
    mod = PositionalEncodingLearned2d(H=16, W=16, hidden_dim=32, dim=128,
                                      key=jax.random.PRNGKey(0))
    out = jax.block_until_ready(mod.forward(B, Hp, Wp))   # auto tile=8 -> 2 steps
    ref = _reference_forward(mod, B, Hp, Wp)
    assert out.shape == (B, 128, Hp, Wp), out.shape
    assert jnp.allclose(out, ref, atol=1e-4, rtol=1e-4), \
        float(jnp.max(jnp.abs(out - ref)))

    # --- Test 2: NCHW-direct kernel path (Wp % 128 == 0, no transpose pass) ---
    B2, Hp2, Wp2 = 2, 8, 128
    mod2 = PositionalEncodingLearned2d(H=8, W=128, hidden_dim=32, dim=64,
                                       key=jax.random.PRNGKey(1))
    out2 = jax.block_until_ready(mod2.forward(B2, Hp2, Wp2))
    ref2 = _reference_forward(mod2, B2, Hp2, Wp2)
    assert out2.shape == (B2, 64, Hp2, Wp2), out2.shape
    assert jnp.allclose(out2, ref2, atol=1e-4, rtol=1e-4), \
        float(jnp.max(jnp.abs(out2 - ref2)))

    print("KERNEL_OK")
</pallas_src>

<mosaic_0001>
module attributes {stable_mosaic.version = 11 : i64} {
  func.func @_add_hwc_kernel(%arg0: i32, %arg1: memref<8x128xf32, #tpu.memory_space<vmem>>, %arg2: memref<16x128xf32, #tpu.memory_space<vmem>>, %arg3: memref<8x16x128xf32, #tpu.memory_space<vmem>>) attributes {dimension_semantics = [#tpu.dimension_semantics<parallel>], iteration_bounds = array<i64: 2>, scalar_prefetch = 0 : i64, scratch_operands = 0 : i64, tpu.core_type = #tpu.core_type<tc>, window_params = [{transform_indices = @transform_0, window_bounds = array<i64: 8, 128>}, {pipeline_mode = #tpu.pipeline_mode<synchronous>, transform_indices = @transform_1, window_bounds = array<i64: 16, 128>}, {transform_indices = @transform_2, window_bounds = array<i64: 8, 16, 128>}]} {
    %c0 = arith.constant 0 : index
    %c0_0 = arith.constant 0 : index
    %0 = vector.load %arg1[%c0, %c0_0] : memref<8x128xf32, #tpu.memory_space<vmem>>, vector<8x128xf32>
    %1 = vector.shape_cast %0 : vector<8x128xf32> to vector<8x1x128xf32>
    %c0_1 = arith.constant 0 : index
    %c0_2 = arith.constant 0 : index
    %2 = vector.load %arg2[%c0_1, %c0_2] : memref<16x128xf32, #tpu.memory_space<vmem>>, vector<16x128xf32>
    %3 = vector.shape_cast %2 : vector<16x128xf32> to vector<1x16x128xf32>
    %4 = vector.broadcast %1 : vector<8x1x128xf32> to vector<8x16x128xf32>
    %5 = vector.broadcast %3 : vector<1x16x128xf32> to vector<8x16x128xf32>
    %6 = arith.addf %4, %5 : vector<8x16x128xf32>
    %c0_3 = arith.constant 0 : index
    %c0_4 = arith.constant 0 : index
    %c0_5 = arith.constant 0 : index
    %7 = vector.load %arg3[%c0_3, %c0_4, %c0_5] : memref<8x16x128xf32, #tpu.memory_space<vmem>>, vector<8x16x128xf32>
    tpu.vector_store %arg3[%c0_3, %c0_4, %c0_5], %6 {strides = array<i32>} : memref<8x16x128xf32, #tpu.memory_space<vmem>>, vector<8x16x128xf32>,
    return
  }
  func.func @transform_0(%arg0: i32) -> (i32, i32) {
    %c0_i32 = arith.constant 0 : i32
    %c0_i32_0 = arith.constant 0 : i32
    return %arg0, %c0_i32 : i32, i32
  }
  func.func @transform_1(%arg0: i32) -> (i32, i32) {
    %c0_i32 = arith.constant 0 : i32
    %c0_i32_0 = arith.constant 0 : i32
    %c0_i32_1 = arith.constant 0 : i32
    return %c0_i32, %c0_i32_0 : i32, i32
  }
  func.func @transform_2(%arg0: i32) -> (i32, i32, i32) {
    %c0_i32 = arith.constant 0 : i32
    %c0_i32_0 = arith.constant 0 : i32
    %c0_i32_1 = arith.constant 0 : i32
    return %arg0, %c0_i32, %c0_i32_0 : i32, i32, i32
  }
}

</mosaic_0001>

<bundles_post_ra>
// kernel: tpu_custom_call.1
= control target key start
LH: loop header
LB: loop body
LE: loop exit
PB: predicated region body
PF: predicated region fallthrough
CT: control target
= control target key end

     0   :  { %7 = vsyncpa [#allocation3], 0  ;;  %s814_s0 = inlined_call_operand.hbm [shape: f32[16,128], index: 0, kind: input, shape index: {}]   ;;  %s815_s1 = inlined_call_operand.hbm [shape: f32[16,128], index: 1, kind: input, shape index: {}]   ;;  %s816_s2 = inlined_call_operand.hbm [shape: f32[16,16,128], index: 2, kind: output, shape index: {}]  }
   0x1   :  { %9 = vsyncpa [#allocation3 + $0x1], 0 }
   0x2   :  { %10 = vsyncpa [#allocation6], 0 }
   0x3   :  { %11 = vsyncpa [#allocation4], 0 }
   0x4   :  { %13 = vsyncpa [#allocation4 + $0x1], 0  ;;  %s626_s9 = smov 0   ;;  %s628_s10 = smov 0  }
   0x5   :  { %s630_s11 = smov 0   ;;  %s632_s12 = smov 0  }
   0x6 LB: > { %s647_s13 = sadd.s32 4294967295, %s601_s12   ;;  %s398_s14 = sadd.s32 4294967294, %s601_s12   ;;  %s601_s12 = sphi %s632_s12, %s838_s12   ;;  %s597_s11 = sphi %s630_s11, %s837_s11   ;;  %s593_s10 = sphi %s628_s10, %s836_s10   ;;  %s589_s9 = sphi %s626_s9, %s835_s9  }
   0x7   : > { %p39_p0 = scmp.ne.s32.totalorder %s593_s10, %s589_s9  ;;  %p817_p1 = scmp.eq.s32.totalorder %s647_s13, 0 }
   0x8   : > { %p90_p3 = scmp.eq.s32.totalorder %s398_s14, 1  ;;  %p399_p5 = scmp.ge.s32.totalorder %s601_s12, 1 }
   0x9   : > { %p656_p4 = por %p817_p1, %p39_p0  ;;  %p97_p7 = scmp.lt.s32.totalorder %s601_s12, 3 }
   0xa   : > { %p661_p6 = por %p90_p3, %p39_p0  ;;  %s603_s18 = smov [#allocation5]  }
   0xb   : > { %s821_s15 = scalar_select %p656_p4, 1, 0 }
   0xc   : > { %s822_s16 = scalar_select %p661_p6, 1, 0 }
   0xd   : > { %p666_p8 = pnand %p399_p5, %p97_p7  ;;  %s109_s19 = sshll.u32 %s603_s18, 4  ;;  %s110_s19 = int_to_ptr.vmem [resolvable:$true] %s109_s19 }
   0xe   : > { %s680_s21 = sadd.s32 1, %s601_s12   ;;  %s26_s22 = sadd.s32 1, %s597_s11 }
   0xf   : > { %s823_s17 = scalar_select %p666_p8, 1, 0 }
  0x10   : > { %p424_p9 = pneg %p666_p8  ;;  %s23_s23 = ssub.s32 %s601_s12, %s680_s21 }
  0x11   : > { %s490_s24 = scalar_lea.vmem %s110_s19, 256  ;;  %p498_p5 = scmp.lt.s32.totalorder %s110_s19, %s110_s19 }
  0x12   : > { %p675_p11 = pnand %p424_p9, %p817_p1  ;;  %p491_p13 = scmp.ne.s32.totalorder %s110_s19, %s490_s24 }
  0x13   : > { %p499_p7 = scmp.lt.s32.totalorder %s490_s24, %s490_s24 }
  0x14   : > { %p481_p12 = pneg %p675_p11 }
  0x15   : > { %p500_p10 = por %p499_p7, %p498_p5 }
  0x16   : > { %p493_p0 = pnand %p491_p13, %p481_p12 }
  0x18   : > { %p494_p3 = pneg %p493_p0 }
  0x1a   : > { %p501_p2 = pnand %p500_p10, %p494_p3 }
  0x1c   : > { %504 = shalt.err (!%p501_p2)
}
  0x1d   : > { %s604_s25 = smov 128   ;;  %s605_s26 = smov 8  }
  0x1e   : > { %427 = dma.hbm_to_vmem [thread:$0]  (!%p675_p11), %s815_s1, 256, %s110_s19, [#allocation6], %s604_s25, %s604_s25, %s605_s26  }
  0x1f   : > { %p24_p9 = scmp.eq.s32.totalorder %s23_s23, 0  ;;  %p33_p12 = scmp.ne.s32.totalorder %s597_s11, %s593_s10 }
  0x20   : > { %p34_p10 = scmp.eq.s32.totalorder %s601_s12, 0  ;;  %p437_p2 = scmp.lt.s32.totalorder %s601_s12, 2 }
  0x21   : > { %s697_s29 = scalar_select %p24_p9, %s597_s11, %s26_s22  }
  0x22   : > { %p35_p13 = por %p34_p10, %p33_p12  ;;  %p825_p0 = scmp.eq.s32.totalorder %s647_s13, 1 }
  0x23   : > { %s123_s3 = sand.u32 1, %s597_s11   ;;  %s403_s4 = sshll.u32 %s601_s12, 7 }
  0x24   : > { %p701_p3 = por %p825_p0, %p33_p12  ;;  %s402_s5 = sshll.u32 %s123_s3, 3 }
  0x25   : > { %s710_s8 = scalar_lea.hbm %s814_s0, %s403_s4  ;;  %s127_s14 = scalar_lea.vmem [#allocation2], %s402_s5 }
  0x26   : > { %s826_s30 = scalar_select %p701_p3, 1, 0 }
  0x27   : > { %s134_s18 = sshll.u32 %s127_s14, 4  ;;  %p712_p11 = pnand %p437_p2, %p35_p13  ;;  %s135_s18 = int_to_ptr.vmem [resolvable:$true] %s134_s18 }
  0x28   : > { %s124_s20 = scalar_lea.sflag [#allocation3], %s123_s3  ;;  %s505_s22 = scalar_lea.hbm %s710_s8, 128 }
  0x29   : > { %p506_p5 = scmp.ne.s32.totalorder %s710_s8, %s505_s22  ;;  %p507_p7 = pneg %p712_p11 }
  0x2a   : > { %s510_s25 = scalar_lea.hbm %s814_s0, 256  ;;  %p511_p10 = scmp.lt.s32.totalorder %s710_s8, %s814_s0 }
  0x2b   : > { %p508_p9 = pnand %p507_p7, %p506_p5  ;;  %p512_p2 = scmp.lt.s32.totalorder %s510_s25, %s505_s22 }
  0x2d   : > { %p509_p12 = pneg %p508_p9  ;;  %p513_p13 = por %p512_p2, %p511_p10 }
  0x2f   : > { %p514_p0 = pnand %p513_p13, %p509_p12 }
  0x31   : > { %517 = shalt.err (!%p514_p0)
}
  0x32   : > { %s518_s28 = scalar_lea.vmem %s135_s18, 128  ;;  %s606_s3 = smov [#allocation2]  }
  0x33   : > { %p519_p1 = scmp.ne.s32.totalorder %s135_s18, %s518_s28  ;;  %s523_s4 = sshll.u32 %s606_s3, 4  ;;  %s524_s4 = int_to_ptr.vmem [resolvable:$false] %s523_s4 }
  0x34   : > { %s525_s5 = scalar_lea.vmem %s524_s4, 256  ;;  %p526_p5 = scmp.lt.s32.totalorder %s135_s18, %s524_s4 }
  0x35   : > { %p521_p6 = pnand %p519_p1, %p507_p7  ;;  %p527_p9 = scmp.lt.s32.totalorder %s525_s5, %s518_s28 }
  0x37   : > { %p522_p3 = pneg %p521_p6  ;;  %p528_p4 = por %p527_p9, %p526_p5 }
  0x39   : > { %p529_p8 = pnand %p528_p4, %p522_p3 }
  0x3b   : > { %532 = shalt.err (!%p529_p8)
}
  0x3c   : > { %431 = dma.hbm_to_vmem [thread:$0]  (!%p712_p11), %s710_s8, 128, %s135_s18, %s124_s20  }
  0x3d   : > { %p828_p12 = scmp.ne.s32.totalorder %s823_s17, 0 }
  0x3e   : > { %s733_s6 = sand.u32 (!%p828_p12), 1, %s593_s10   ;;  %p829_p1 = scmp.ne.s32.totalorder (!%p828_p12), %s821_s15, 0 }
  0x3f   : > { %143 = sbr.rel (%p828_p12) target bundleno = 109 (0x6d), region = 28  ;;  %s405_s7 = sshll.u32 (!%p828_p12), %s733_s6, 3 }
  0x40   : > { %s146_s14 = scalar_lea.sflag (!%p828_p12), [#allocation3], %s733_s6  ;;  %s149_s22 = scalar_lea.vmem (!%p828_p12), [#allocation2], %s405_s7 }
  0x44   : > { %576 = dma.done.wait (%p829_p1), %s146_s14, 128  }
  0x45   : > { %578 = vsyncadd (%p829_p1), %s146_s14, 4294967168  ;;  %p830_p4 = scmp.eq.s32.totalorder %s647_s13, 0 }
  0x47   : > { %580 = dma.done.wait (%p830_p4), [#allocation6], 256   ;;  %p831_p6 = pmov %p830_p4 }
  0x48   : > { %v181_v0 = vlaneseq  ;;  %v607_v1 = vmov 1966171168   ;;  %v175_v6 = vld [vmem:[%s149_s22] sm:$0xff]  ;;  %s407_s17 = sshll.u32 %s733_s6, 7  ;;  %v226_v13 = vld [vmem:[#allocation5] sm:$0xff]  ;;  %v227_v14 = vld [vmem:[#allocation5 + $0x8] sm:$0xff] }
  0x49   : > { %582 = vsyncadd (%p831_p6), [#allocation6], 4294967040  ;;  %v179_v2 = vunpack.c.l.s4 %v607_v1  ;;  %v177_v9 = vcombine.high %v175_v6, %v175_v6  ;;  %s746_s15 = scalar_lea.vmem [#allocation7], %s407_s17  ;;  %s415_s8 = sshll.u32 %s647_s13, 11 }
  0x4a   : > { %v182_v3 = vshrl.u32 %v181_v0, 7  ;;  %s315_s18 = sshll.u32 %s746_s15, 4  ;;  %s765_s20 = scalar_lea.hbm %s816_s2, %s415_s8  ;;  %s767_s18 = int_to_ptr.vmem [resolvable:$true] %s315_s18 }
  0x4b   : > { %v180_v4 = vunpack.c.0.s8 %v179_v2  ;;  %s301_s23 = scalar_lea.sflag [#allocation4], %s733_s6  ;;  %s533_s24 = scalar_lea.vmem %s767_s18, 2048 }
  0x4c   : > { %v230_v8 = vsub.s32 0, %v182_v3  ;;  %p534_p8 = scmp.ne.s32.totalorder %s767_s18, %s533_s24  ;;  %p832_p3 = scmp.ne.s32.totalorder %s826_s30, 0 }
  0x4d   : > { %v183_v5 = vsub.s32 %v180_v4, %v182_v3  ;;  %s608_s25 = smov [#allocation7]  }
  0x4e   : > { %p535_p11 = pnand %p534_p8, %p832_p3  ;;  %s537_s26 = sshll.u32 %s608_s25, 4  ;;  %s538_s26 = int_to_ptr.vmem [resolvable:$false] %s537_s26 }
  0x4f   : > { %v184_v7 = vrot.slane %v175_v6, %v183_v5  ;;  %v191_v12 = vrot.slane %v177_v9, %v183_v5  ;;  %s539_s27 = scalar_lea.vmem %s538_s26, 4096  ;;  %p540_p10 = scmp.lt.s32.totalorder %s767_s18, %s538_s26 }
  0x50   : > { %p536_p7 = pneg %p535_p11  ;;  %p541_p2 = scmp.lt.s32.totalorder %s539_s27, %s533_s24 }
  0x51   : > { %v200_v10 = vrot.slane %v184_v7, %v183_v5  ;;  %v192_v11 = vcombine.high %v184_v7, %v184_v7  ;;  %v207_v18 = vrot.slane %v191_v12, %v183_v5  ;;  %v193_v19 = vcombine.high %v191_v12, %v191_v12 }
  0x52   : > { %p542_p13 = por %p541_p2, %p540_p10 }
  0x53   : > { %v231_v15 = vrot.slane %v200_v10, %v230_v8  ;;  %v214_v16 = vrot.slane %v192_v11, %v183_v5  ;;  %v222_v17 = vcombine.high %v200_v10, %v200_v10  ;;  %v247_v25 = vrot.slane %v207_v18, %v230_v8 }
  0x54   : > { %v221_v26 = vrot.slane %v193_v19, %v183_v5  ;;  %v223_v27 = vcombine.high %v207_v18, %v207_v18  ;;  %p543_p0 = pnand %p542_p13, %p536_p7 }
  0x55   : > { %v268_v20 = vadd.f32 %v231_v15, %v226_v13  ;;  %v269_v21 = vadd.f32 %v231_v15, %v227_v14  ;;  %v235_v22 = vrot.slane %v214_v16, %v230_v8  ;;  %v239_v23 = vrot.slane %v222_v17, %v230_v8 }
  0x56   : > { %v224_v24 = vcombine.high %v214_v16, %v214_v16  ;;  %v276_v33 = vadd.f32 %v247_v25, %v226_v13  ;;  %v277_v34 = vadd.f32 %v247_v25, %v227_v14  ;;  %v251_v35 = vrot.slane %v221_v26, %v230_v8 }
  0x57   : > { %284 = vst [vmem:[%s746_s15] sm:$0xff] %v268_v20  ;;  %285 = vst [vmem:[%s746_s15 + $0x8] sm:$0xff] %v269_v21  ;;  %v270_v28 = vadd.f32 %v235_v22, %v226_v13  ;;  %v271_v29 = vadd.f32 %v235_v22, %v227_v14  ;;  %v272_v30 = vadd.f32 %v239_v23, %v226_v13 }
  0x58   : > { %v273_v31 = vadd.f32 %v239_v23, %v227_v14  ;;  %v243_v32 = vrot.slane %v224_v24, %v230_v8  ;;  %v255_v36 = vrot.slane %v223_v27, %v230_v8  ;;  %v225_v37 = vcombine.high %v221_v26, %v221_v26  ;;  %292 = vst [vmem:[%s746_s15 + $0x40] sm:$0xff] %v276_v33 }
  0x59   : > { %286 = vst [vmem:[%s746_s15 + $0x10] sm:$0xff] %v270_v28  ;;  %287 = vst [vmem:[%s746_s15 + $0x18] sm:$0xff] %v271_v29  ;;  %v278_v40 = vadd.f32 %v251_v35, %v226_v13  ;;  %v279_v41 = vadd.f32 %v251_v35, %v227_v14 }
  0x5a   : > { %288 = vst [vmem:[%s746_s15 + $0x20] sm:$0xff] %v272_v30  ;;  %289 = vst [vmem:[%s746_s15 + $0x28] sm:$0xff] %v273_v31  ;;  %v274_v38 = vadd.f32 %v243_v32, %v226_v13  ;;  %v275_v39 = vadd.f32 %v243_v32, %v227_v14  ;;  %v280_v42 = vadd.f32 %v255_v36, %v226_v13 }
  0x5b   : > { %293 = vst [vmem:[%s746_s15 + $0x48] sm:$0xff] %v277_v34  ;;  %v281_v43 = vadd.f32 %v255_v36, %v227_v14  ;;  %v259_v44 = vrot.slane %v225_v37, %v230_v8  ;;  %294 = vst [vmem:[%s746_s15 + $0x50] sm:$0xff] %v278_v40 }
  0x5c   : > { %290 = vst [vmem:[%s746_s15 + $0x30] sm:$0xff] %v274_v38  ;;  %291 = vst [vmem:[%s746_s15 + $0x38] sm:$0xff] %v275_v39 }
  0x5d   : > { %295 = vst [vmem:[%s746_s15 + $0x58] sm:$0xff] %v279_v41  ;;  %296 = vst [vmem:[%s746_s15 + $0x60] sm:$0xff] %v280_v42  ;;  %v282_v45 = vadd.f32 %v259_v44, %v226_v13  ;;  %v283_v46 = vadd.f32 %v259_v44, %v227_v14 }
  0x5e   : > { %297 = vst [vmem:[%s746_s15 + $0x68] sm:$0xff] %v281_v43 }
  0x5f   : > { %298 = vst [vmem:[%s746_s15 + $0x70] sm:$0xff] %v282_v45  ;;  %299 = vst [vmem:[%s746_s15 + $0x78] sm:$0xff] %v283_v46 }
  0x60   : > { %546 = shalt.err (!%p543_p0)
}
  0x61   : > { %s547_s28 = scalar_lea.hbm %s765_s20, 2048  ;;  %s551_s5 = scalar_lea.hbm %s816_s2, 4096 }
  0x62   : > { %p548_p5 = scmp.ne.s32.totalorder %s765_s20, %s547_s28  ;;  %p552_p1 = scmp.lt.s32.totalorder %s765_s20, %s816_s2 }
  0x63   : > { %p553_p4 = scmp.lt.s32.totalorder %s551_s5, %s547_s28 }
  0x64   : > { %p549_p9 = pnand %p548_p5, %p832_p3 }
  0x65   : > { %p554_p6 = por %p553_p4, %p552_p1 }
  0x66   : > { %p550_p12 = pneg %p549_p9 }
  0x68   : > { %p555_p8 = pnand %p554_p6, %p550_p12 }
  0x6a   : > { %558 = shalt.err (!%p555_p8)
}
  0x6b   : > { %s609_s22 = smov 128   ;;  %s610_s17 = smov 8  }
  0x6c   : > { %422 = dma.vmem_to_hbm [thread:$0]  (%p832_p3), %s767_s18, 2048, %s765_s20, %s301_s23, %s609_s22, %s609_s22, %s610_s17  }
  0x6d PF: > { %s330_s15 = sand.u32 1, %s589_s9   ;;  %p833_p11 = scmp.ne.s32.totalorder %s822_s16, 0 }
  0x6e   : > { %p834_p7 = scmp.ge.s32.totalorder %s601_s12, 2  ;;  %s331_s8 = scalar_lea.sflag [#allocation4], %s330_s15 }
  0x70   : > { %p433_p10 = pnand %p834_p7, %p833_p11 }
  0x72   : > { %p434_p2 = pneg %p433_p10 }
  0x74   : > { %584 = dma.done.wait (%p434_p2), %s331_s8, 2048  }
  0x75   : > { %586 = vsyncadd (%p434_p2), %s331_s8, 4294965248  ;;  %p16_p13 = scmp.ge.s32.totalorder %s680_s21, 4   ;;  %s835_s9 = smov %s593_s10 }
  0x76   : > { %s836_s10 = smov %s597_s11  ;;  %s837_s11 = smov %s697_s29 }
  0x77   : > { %s838_s12 = smov %s680_s21  ;;  %18 = sbr.rel (!%p16_p13) target bundleno = 6 (0x6), region = 77 }
  0x7c   :  { %336 = vsyncpa [#allocation3], 1 }
  0x7d   :  { %338 = vsyncpa [#allocation3 + $0x1], 1 }
  0x7e   :  { %339 = vsyncpa [#allocation6], 1 }
  0x7f   :  { %340 = vsyncpa [#allocation4], 1 }
  0x80   :  { %342 = vsyncpa [#allocation4 + $0x1], 1 }

</bundles_post_ra>
